<compile_context>
chip_gen: v5e
topology: v5e:2x2
jax: 0.10.0
libtpu: 0.0.40
codegen_flags: <defaults>
</compile_context>

<pallas_src>
import jax
import jax.numpy as jnp
from jax.experimental import pallas as pl
from jax.experimental.pallas import tpu as pltpu

_TARGET_BLOCK_BYTES = 4 * 1024 * 1024  # ~4 MiB per block (any dtype)


def _mish_kernel(x_ref, o_ref):
    x = x_ref[...].astype(jnp.float32)
    # tanh(softplus(x)) = ((1+e^x)^2 - 1) / ((1+e^x)^2 + 1)
    # Written with t = exp(-|x|) in (0, 1] so nothing ever overflows:
    #   x >= 0:  (1 + 2t) / (1 + 2t + 2t^2)
    #   x <  0:  (t^2 + 2t) / (t^2 + 2t + 2)
    t = jnp.exp(-jnp.abs(x))                       # single EUP transcendental
    pos = x >= 0.0
    num = jnp.where(pos, 1.0 + 2.0 * t, t * (t + 2.0))
    den = num + jnp.where(pos, 2.0 * t * t, 2.0)   # den in (1, 5], always safe
    r = pl.reciprocal(den, approx=True)            # EUP vrcp (free-ish slot)
    r = r * (2.0 - den * r)                        # Newton step 1
    # Newton step 2: pure VALU filler in the mem-bound f32 regime; droppable
    # on v7x/bf16 only after re-validating against the 1e-5 tolerance (vrcp
    # approx precision makes a single step borderline).
    r = r * (2.0 - den * r)
    o_ref[...] = (x * num * r).astype(o_ref.dtype)


def _round_up(a, m):
    return ((a + m - 1) // m) * m


def _cdiv(a, b):
    return -(-a // b)


def mish(x):
    """Apply Mish elementwise. Accepts any shape (e.g. NCHW)."""
    orig_shape = x.shape
    orig_dtype = x.dtype
    n = x.size
    itemsize = jnp.dtype(orig_dtype).itemsize
    # Native sublane tile for the dtype: 8 (f32), 16 (bf16), 32 (int8 / fp8).
    sublane = max(8, 32 // itemsize)

    # Pick a lane-dense slab width (multiple of 128) that divides n so we can
    # reshape in place with no padding copy. NCHW activation sizes virtually
    # always hit one of these.
    width = None
    for w in (2048, 1024, 512, 256, 128):
        if n % w == 0:
            width = w
            break

    if width is None:
        # Fallback for awkward sizes: pad once to a multiple of sublane*128.
        # TODO(synk): handle the ragged tail with an in-kernel masked final
        # block to avoid this extra HBM pad + slice round-trip.
        width = 128
        n_pad = _round_up(n, sublane * width)
        x_flat = jnp.concatenate(
            [jnp.reshape(x, (-1,)), jnp.zeros((n_pad - n,), dtype=orig_dtype)]
        )
    else:
        n_pad = n
        x_flat = jnp.reshape(x, (-1,))

    rows = n_pad // width
    x2d = jnp.reshape(x_flat, (rows, width))

    # Block sizing: ~4 MiB per block (byte budget), row count a multiple of
    # the dtype sublane tile, and >= 8 grid steps with an even count whenever
    # the slab is big enough (keeps v7x's two TensorCores balanced/pipelined).
    if rows <= sublane:
        tr = rows  # block row-dim equals full array dim -> always legal
    else:
        budget_rows = max(
            sublane,
            ((_TARGET_BLOCK_BYTES // (width * itemsize)) // sublane) * sublane,
        )
        rows_div8 = max(sublane, _round_up(_cdiv(rows, 8), sublane))
        tr = min(budget_rows, rows_div8)
        if _cdiv(rows, tr) < 2:
            # Never leave a single-step (unpipelined, single-core) grid.
            tr = min(tr, max(sublane, _round_up(_cdiv(rows, 2), sublane)))
        steps = _cdiv(rows, tr)
        if steps > 1 and steps % 2 == 1:
            # Nudge toward an even step count so the 2-TC split stays balanced.
            tr_even = max(sublane, _round_up(_cdiv(rows, steps + 1), sublane))
            if _cdiv(rows, tr_even) % 2 == 0:
                tr = tr_even
    grid = (_cdiv(rows, tr),)

    block_bytes = tr * width * itemsize
    # in + out, double-buffered = 4x block bytes. Raise v5e's 16 MiB default
    # scoped VMEM, but cap at 48 MiB to leave headroom under v7x's 64 MiB.
    vmem_limit = min(max(4 * block_bytes + (4 << 20), 32 << 20), 48 << 20)

    cost = pl.CostEstimate(
        flops=15 * n,
        transcendentals=2 * n,
        bytes_accessed=2 * n * itemsize,
    )

    out2d = pl.pallas_call(
        _mish_kernel,
        out_shape=jax.ShapeDtypeStruct((rows, width), orig_dtype),
        grid_spec=pltpu.PrefetchScalarGridSpec(
            num_scalar_prefetch=0,
            grid=grid,
            in_specs=[pl.BlockSpec((tr, width), lambda i: (i, 0))],
            out_specs=pl.BlockSpec((tr, width), lambda i: (i, 0)),
        ),
        compiler_params=pltpu.CompilerParams(
            dimension_semantics=("parallel",),
            vmem_limit_bytes=vmem_limit,
        ),
        cost_estimate=cost,
    )(x2d)

    if n_pad != n:
        out_flat = jnp.reshape(out2d, (-1,))[:n]
        return jnp.reshape(out_flat, orig_shape)
    return jnp.reshape(out2d, orig_shape)


def mish_ref(x):
    xf = x.astype(jnp.float32)
    return (xf * jnp.tanh(jax.nn.softplus(xf))).astype(x.dtype)


if __name__ == "__main__":
    key = jax.random.PRNGKey(0)
    x = jax.random.normal(key, (2, 4, 16, 16), dtype=jnp.float32)  # NCHW

    out = mish(x)
    out = jax.block_until_ready(out)

    ref = mish_ref(x)
    assert out.shape == x.shape and out.dtype == x.dtype
    assert jnp.allclose(out, ref, atol=1e-5, rtol=1e-5), (
        float(jnp.max(jnp.abs(out - ref)))
    )
    print("KERNEL_OK")
</pallas_src>

<mosaic_0001>
module attributes {stable_mosaic.version = 11 : i64} {
  func.func @_mish_kernel(%arg0: i32, %arg1: memref<1x2048xf32, #tpu.memory_space<vmem>>, %arg2: memref<1x2048xf32, #tpu.memory_space<vmem>>) attributes {dimension_semantics = [#tpu.dimension_semantics<parallel>], iteration_bounds = array<i64: 1>, scalar_prefetch = 0 : i64, scratch_operands = 0 : i64, tpu.core_type = #tpu.core_type<tc>, window_params = [{transform_indices = @transform_0, window_bounds = array<i64: 1, 2048>}, {transform_indices = @transform_1, window_bounds = array<i64: 1, 2048>}]} {
    %c0 = arith.constant 0 : index
    %c0_0 = arith.constant 0 : index
    %0 = vector.load %arg1[%c0, %c0_0] : memref<1x2048xf32, #tpu.memory_space<vmem>>, vector<1x2048xf32>
    %1 = math.absf %0 : vector<1x2048xf32>
    %cst = arith.constant 0.000000e+00 : f32
    %2 = vector.broadcast %cst : f32 to vector<1x2048xf32>
    %3 = arith.subf %2, %1 : vector<1x2048xf32>
    %4 = math.exp %3 : vector<1x2048xf32>
    %cst_1 = arith.constant 0.000000e+00 : f32
    %5 = vector.broadcast %cst_1 : f32 to vector<1x2048xf32>
    %6 = arith.cmpf oge, %0, %5 : vector<1x2048xf32>
    %cst_2 = arith.constant 2.000000e+00 : f32
    %7 = vector.broadcast %cst_2 : f32 to vector<1x2048xf32>
    %8 = arith.mulf %7, %4 : vector<1x2048xf32>
    %cst_3 = arith.constant 1.000000e+00 : f32
    %9 = vector.broadcast %cst_3 : f32 to vector<1x2048xf32>
    %10 = arith.addf %9, %8 : vector<1x2048xf32>
    %cst_4 = arith.constant 2.000000e+00 : f32
    %11 = vector.broadcast %cst_4 : f32 to vector<1x2048xf32>
    %12 = arith.addf %4, %11 : vector<1x2048xf32>
    %13 = arith.mulf %4, %12 : vector<1x2048xf32>
    %14 = arith.select %6, %10, %13 : vector<1x2048xi1>, vector<1x2048xf32>
    %cst_5 = arith.constant 2.000000e+00 : f32
    %15 = vector.broadcast %cst_5 : f32 to vector<1x2048xf32>
    %16 = arith.mulf %15, %4 : vector<1x2048xf32>
    %17 = arith.mulf %16, %4 : vector<1x2048xf32>
    %cst_6 = arith.constant 2.000000e+00 : f32
    %18 = vector.broadcast %cst_6 : f32 to vector<1x2048xf32>
    %19 = arith.select %6, %17, %18 : vector<1x2048xi1>, vector<1x2048xf32>
    %20 = arith.addf %14, %19 : vector<1x2048xf32>
    %21 = tpu.reciprocal %20 {approx = true} : vector<1x2048xf32> -> vector<1x2048xf32>
    %22 = arith.mulf %20, %21 : vector<1x2048xf32>
    %cst_7 = arith.constant 2.000000e+00 : f32
    %23 = vector.broadcast %cst_7 : f32 to vector<1x2048xf32>
    %24 = arith.subf %23, %22 : vector<1x2048xf32>
    %25 = arith.mulf %21, %24 : vector<1x2048xf32>
    %26 = arith.mulf %20, %25 : vector<1x2048xf32>
    %cst_8 = arith.constant 2.000000e+00 : f32
    %27 = vector.broadcast %cst_8 : f32 to vector<1x2048xf32>
    %28 = arith.subf %27, %26 : vector<1x2048xf32>
    %29 = arith.mulf %25, %28 : vector<1x2048xf32>
    %30 = arith.mulf %0, %14 : vector<1x2048xf32>
    %31 = arith.mulf %30, %29 : vector<1x2048xf32>
    %c0_9 = arith.constant 0 : index
    %c0_10 = arith.constant 0 : index
    %32 = vector.load %arg2[%c0_9, %c0_10] : memref<1x2048xf32, #tpu.memory_space<vmem>>, vector<1x2048xf32>
    tpu.vector_store %arg2[%c0_9, %c0_10], %31 {strides = array<i32>} : memref<1x2048xf32, #tpu.memory_space<vmem>>, vector<1x2048xf32>,
    return
  }
  func.func @transform_0(%arg0: i32) -> (i32, i32) {
    %c0_i32 = arith.constant 0 : i32
    %c0_i32_0 = arith.constant 0 : i32
    return %arg0, %c0_i32 : i32, i32
  }
  func.func @transform_1(%arg0: i32) -> (i32, i32) {
    %c0_i32 = arith.constant 0 : i32
    %c0_i32_0 = arith.constant 0 : i32
    return %arg0, %c0_i32 : i32, i32
  }
}

</mosaic_0001>

<bundles_post_ra>
// kernel: tpu_custom_call.1
= control target key start
LH: loop header
LB: loop body
LE: loop exit
PB: predicated region body
PF: predicated region fallthrough
CT: control target
= control target key end

     0   :  { %6 = vsyncpa [#allocation3], 0  ;;  %s168_s0 = inlined_call_operand.hbm [shape: f32[1,2048], index: 0, kind: input, shape index: {}]   ;;  %s169_s1 = inlined_call_operand.hbm [shape: f32[1,2048], index: 1, kind: output, shape index: {}]  }
   0x1   :  { %7 = vsyncpa [#allocation4], 0  ;;  %s13_s8 = sshll.u32 %s168_s0, 4  ;;  %s150_s9 = smov [#allocation2]   ;;  %s14_s8 = int_to_ptr.hbm [resolvable:$true] %s13_s8 }
   0x2   :  { %s15_s10 = sshll.u32 %s150_s9, 4  ;;  %s16_s10 = int_to_ptr.vmem [resolvable:$true] %s15_s10 }
   0x3   :  { %18 = dma.hbm_to_vmem [thread:$0]  %s14_s8, 256, %s16_s10, [#allocation3]  }
   0x4   :  { %146 = dma.done.wait [#allocation3], 256  }
   0x5   :  { %147 = vsyncadd [#allocation3], 4294967040  ;;  %v23_v0 = vld [vmem:[#allocation2] sm:$0xff]  ;;  %v24_v1 = vld [vmem:[#allocation2 + $0x8] sm:$0xff]  ;;  %s151_s0 = smov [#allocation5]   ;;  %s78_s14 = sshll.u32 %s169_s1, 4  ;;  %s79_s14 = int_to_ptr.hbm [resolvable:$true] %s78_s14 }
   0x6   :  { %v25_v2 = vand.u32 2147483647, %v23_v0  ;;  %v26_v3 = vand.u32 2147483647, %v24_v1  ;;  %vm33_vm0 = vcmp.ge.f32.partialorder %v23_v0, 0.0  ;;  %vm34_vm1 = vcmp.ge.f32.partialorder %v24_v1, 0.0 }
   0x7   :  { %s76_s11 = sshll.u32 %s151_s0, 4  ;;  %s77_s11 = int_to_ptr.vmem [resolvable:$true] %s76_s11 }
   0x8   :  { %v27_v4 = vsub.f32 0.0, %v25_v2  ;;  %v28_v5 = vsub.f32 0.0, %v26_v3 }
   0xa   :  { %v29_v6 = vmul.f32 1.442695, %v27_v4  ;;  %v31_v7 = vmul.f32 1.442695, %v28_v5 }
   0xc   :  { %90 = vpow2.f32 %v29_v6 }
   0xd   :  { %92 = vpow2.f32 %v31_v7 }
  0x12   :  { %v91_v8 = vpop.eup %90 }
  0x13   :  { %v93_v9 = vpop.eup %92  ;;  %v35_v10 = vmul.f32 2.0, %v91_v8  ;;  %v39_v11 = vadd.f32 2.0, %v91_v8 }
  0x14   :  { %v36_v12 = vmul.f32 2.0, %v93_v9  ;;  %v40_v13 = vadd.f32 2.0, %v93_v9 }
  0x15   :  { %v37_v14 = vadd.f32 1.0, %v35_v10  ;;  %v41_v15 = vmul.f32 %v91_v8, %v39_v11  ;;  %v45_v16 = vmul.f32 %v91_v8, %v35_v10 }
  0x16   :  { %v38_v17 = vadd.f32 1.0, %v36_v12  ;;  %v42_v18 = vmul.f32 %v93_v9, %v40_v13  ;;  %v46_v19 = vmul.f32 %v93_v9, %v36_v12 }
  0x17   :  { %v43_v20 = vsel %vm33_vm0, %v37_v14, %v41_v15  ;;  %v47_v21 = vsel %vm33_vm0, %v45_v16, 2.0 }
  0x18   :  { %v49_v22 = vadd.f32 %v47_v21, %v43_v20  ;;  %v44_v23 = vsel %vm34_vm1, %v38_v17, %v42_v18  ;;  %v48_v24 = vsel %vm34_vm1, %v46_v19, 2.0  ;;  %v65_v37 = vmul.f32 %v43_v20, %v23_v0 }
  0x19   :  { %v50_v25 = vadd.f32 %v48_v24, %v44_v23  ;;  %v66_v39 = vmul.f32 %v44_v23, %v24_v1 }
  0x1a   :  { %94 = vrcp.f32 %v49_v22 }
  0x1b   :  { %96 = vrcp.f32 %v50_v25 }
  0x20   :  { %v95_v26 = vpop.eup %94 }
  0x21   :  { %v97_v27 = vpop.eup %96  ;;  %v53_v28 = vmul.f32 %v95_v26, %v49_v22 }
  0x22   :  { %v54_v29 = vmul.f32 %v97_v27, %v50_v25 }
  0x23   :  { %v55_v30 = vsub.f32 2.0, %v53_v28 }
  0x24   :  { %v56_v31 = vsub.f32 2.0, %v54_v29 }
  0x25   :  { %v57_v32 = vmul.f32 %v95_v26, %v55_v30 }
  0x26   :  { %v58_v33 = vmul.f32 %v97_v27, %v56_v31 }
  0x27   :  { %v59_v34 = vmul.f32 %v57_v32, %v49_v22 }
  0x28   :  { %v60_v35 = vmul.f32 %v58_v33, %v50_v25 }
  0x29   :  { %v61_v36 = vsub.f32 2.0, %v59_v34 }
  0x2a   :  { %v62_v38 = vsub.f32 2.0, %v60_v35 }
  0x2b   :  { %v63_v40 = vmul.f32 %v61_v36, %v57_v32 }
  0x2c   :  { %v64_v41 = vmul.f32 %v62_v38, %v58_v33 }
  0x2d   :  { %v67_v42 = vmul.f32 %v65_v37, %v63_v40 }
  0x2e   :  { %v68_v43 = vmul.f32 %v66_v39, %v64_v41 }
  0x2f   :  { %69 = vst [vmem:[#allocation5] sm:$0xff] %v67_v42 }
  0x30   :  { %70 = vst [vmem:[#allocation5 + $0x8] sm:$0xff] %v68_v43 }
  0x31   :  { %81 = dma.vmem_to_hbm [thread:$0]  %s77_s11, 256, %s79_s14, [#allocation4]  }
  0x32   :  { %148 = dma.done.wait [#allocation4], 256  }
  0x33   :  { %149 = vsyncadd [#allocation4], 4294967040 }
  0x34   :  { %86 = vsyncpa [#allocation3], 1 }
  0x35   :  { %87 = vsyncpa [#allocation4], 1 }

</bundles_post_ra>
